<compile_context>
chip_gen: v6e
topology: v6e:2x2x1
jax: 0.10.0
libtpu: 0.0.40
codegen_flags: <defaults>
</compile_context>

<pallas_src>
import math
import functools

import jax
import jax.numpy as jnp
from jax.experimental import pallas as pl
from jax.experimental.pallas import tpu as pltpu


# ----------------------------- tiling helpers ---------------------------------

def _pick(dim, prefs):
    """Largest preferred tile that evenly divides `dim`, else the full dim."""
    for p in prefs:
        if dim % p == 0:
            return p
    return dim


_VMEM_CAP = 56 << 20          # stay under v7x's 64 MiB physical per-TC VMEM


def _mosaic_params(dim_sem, footprint_bytes):
    """CompilerParams with an explicit VMEM limit derived from the footprint."""
    limit = int(min(max(int(footprint_bytes * 1.5) + (4 << 20), 32 << 20),
                    _VMEM_CAP))
    return pltpu.CompilerParams(dimension_semantics=dim_sem,
                                vmem_limit_bytes=limit)


# ----------------------- tiled matmul + bias (+ ReLU) --------------------------

def _mm_bias_kernel(x_ref, w_ref, b_ref, o_ref, acc_ref, *, relu):
    k = pl.program_id(2)

    @pl.when(k == 0)
    def _():
        acc_ref[...] = jnp.zeros_like(acc_ref)

    acc_ref[...] += jnp.dot(x_ref[...], w_ref[...],
                            preferred_element_type=jnp.float32)

    @pl.when(k == pl.num_programs(2) - 1)
    def _():
        r = acc_ref[...] + b_ref[...]
        if relu:
            r = jnp.maximum(r, 0.0)
        o_ref[...] = r.astype(o_ref.dtype)


def matmul_bias(x, w, b, *, relu=False, out_dtype=jnp.bfloat16):
    """y = x @ w + b (optional ReLU).  x:(M,K) bf16, w:(K,N) bf16, b:(N,) f32."""
    M, K = x.shape
    N = w.shape[1]
    tm = _pick(M, (512, 256, 128))
    tn = _pick(N, (1024, 512, 256, 128))
    tk = _pick(K, (1024, 512, 256, 128))
    grid = (M // tm, N // tn, K // tk)
    kern = functools.partial(_mm_bias_kernel, relu=relu)
    out_bytes = jnp.dtype(out_dtype).itemsize
    bytes_in = (M * K + K * N) * x.dtype.itemsize + N * 4 + M * N * out_bytes
    footprint = (2 * (tm * tk + tk * tn) * 2       # x / w blocks, double-buffered bf16
                 + 2 * tn * 4                      # bias block
                 + 2 * tm * tn * out_bytes         # output block
                 + tm * tn * 4)                    # f32 accumulator
    return pl.pallas_call(
        kern,
        out_shape=jax.ShapeDtypeStruct((M, N), out_dtype),
        grid=grid,
        in_specs=[pl.BlockSpec((tm, tk), lambda i, j, k: (i, k)),
                  pl.BlockSpec((tk, tn), lambda i, j, k: (k, j)),
                  pl.BlockSpec((1, tn), lambda i, j, k: (0, j))],
        out_specs=pl.BlockSpec((tm, tn), lambda i, j, k: (i, j)),
        scratch_shapes=[pltpu.VMEM((tm, tn), jnp.float32)],
        compiler_params=_mosaic_params(("parallel", "parallel", "arbitrary"),
                                       footprint),
        cost_estimate=pl.CostEstimate(flops=2 * M * N * K, transcendentals=0,
                                      bytes_accessed=int(bytes_in)),
    )(x, w, b.reshape(1, N).astype(jnp.float32))


# ------------- tiled matmul + bias + residual-add + LayerNorm ------------------

def _mm_res_ln_kernel(x_ref, w_ref, b_ref, res_ref, g_ref, be_ref, o_ref, acc_ref,
                      *, eps):
    k = pl.program_id(1)

    @pl.when(k == 0)
    def _():
        acc_ref[...] = jnp.zeros_like(acc_ref)

    acc_ref[...] += jnp.dot(x_ref[...], w_ref[...],
                            preferred_element_type=jnp.float32)

    @pl.when(k == pl.num_programs(1) - 1)
    def _():
        z = acc_ref[...] + b_ref[...] + res_ref[...].astype(jnp.float32)
        mean = jnp.mean(z, axis=-1, keepdims=True)
        var = jnp.mean(jnp.square(z - mean), axis=-1, keepdims=True)
        o_ref[...] = ((z - mean) * jax.lax.rsqrt(var + eps)
                      * g_ref[...] + be_ref[...]).astype(o_ref.dtype)


def matmul_res_ln(x, w, b, res, gamma, beta, *, eps=1e-5):
    """LayerNorm(x @ w + b + res) -> bf16.  x:(M,K) bf16, w:(K,D) bf16, res:(M,D) bf16."""
    M, K = x.shape
    D = w.shape[1]
    tm = _pick(M, (512, 256, 128))
    tk = _pick(K, (1024, 512, 256, 128))
    grid = (M // tm, K // tk)
    kern = functools.partial(_mm_res_ln_kernel, eps=eps)
    bytes_in = (M * K + K * D) * x.dtype.itemsize + 2 * M * D * 2 + 3 * D * 4
    footprint = (2 * tm * tk * 2                   # x block
                 + 2 * tk * D * 2                  # w block
                 + 2 * tm * D * 2                  # residual block (bf16)
                 + 6 * D * 4                       # bias / gamma / beta
                 + 2 * tm * D * 2                  # output block
                 + tm * D * 4)                     # f32 accumulator
    return pl.pallas_call(
        kern,
        out_shape=jax.ShapeDtypeStruct((M, D), jnp.bfloat16),
        grid=grid,
        in_specs=[pl.BlockSpec((tm, tk), lambda i, k: (i, k)),
                  pl.BlockSpec((tk, D), lambda i, k: (k, 0)),
                  pl.BlockSpec((1, D), lambda i, k: (0, 0)),
                  pl.BlockSpec((tm, D), lambda i, k: (i, 0)),
                  pl.BlockSpec((1, D), lambda i, k: (0, 0)),
                  pl.BlockSpec((1, D), lambda i, k: (0, 0))],
        out_specs=pl.BlockSpec((tm, D), lambda i, k: (i, 0)),
        scratch_shapes=[pltpu.VMEM((tm, D), jnp.float32)],
        compiler_params=_mosaic_params(("parallel", "arbitrary"), footprint),
        cost_estimate=pl.CostEstimate(flops=2 * M * D * K + 10 * M * D,
                                      transcendentals=M,
                                      bytes_accessed=int(bytes_in)),
    )(x, w, b.reshape(1, D).astype(jnp.float32), res,
      gamma.reshape(1, D), beta.reshape(1, D))


# ------------------------ fused multi-head attention ---------------------------
# Grid = (B, Lq // tq); Q is a (1, tq, D) block, K/V are (1, Lk, D) lane-blocks of
# the fused QKV / KV projection that stay resident across q-tiles.

def _pad_bias(ids_row, tq, lk):
    """Additive pad mask (tq, lk) from key token ids (1, lk)."""
    pad = jnp.where(ids_row != 0, 0.0, -1e9).astype(jnp.float32)
    return jnp.broadcast_to(pad, (tq, lk))


def _attn_heads(q_ref, k_ref, v_ref, o_ref, bias, num_heads, scale):
    """Per-head attention on ref lane-slices; results written straight to o_ref."""
    D = q_ref.shape[-1]
    Dh = D // num_heads
    for h in range(num_heads):                         # static Python loop over heads
        sl = pl.ds(h * Dh, Dh)
        qh = q_ref[0, :, sl] * scale                   # scale folded into Q (bf16)
        kh = k_ref[0, :, sl]
        s = jax.lax.dot_general(qh, kh, (((1,), (1,)), ((), ())),
                                preferred_element_type=jnp.float32) + bias
        s = s - jnp.max(s, axis=-1, keepdims=True)
        p = jnp.exp(s)
        p = p * pl.reciprocal(jnp.sum(p, axis=-1, keepdims=True), approx=True)
        o_ref[0, :, sl] = jnp.dot(p.astype(v_ref.dtype), v_ref[0, :, sl],
                                  preferred_element_type=jnp.float32
                                  ).astype(o_ref.dtype)


def _mha_self_kernel(ids_ref, q_ref, k_ref, v_ref, o_ref, *,
                     num_heads, scale, causal, tq):
    lk = k_ref.shape[1]
    bias = _pad_bias(ids_ref[0], tq, lk)
    if causal:
        q0 = pl.program_id(1) * tq
        row = jax.lax.broadcasted_iota(jnp.int32, (tq, lk), 0) + q0
        col = jax.lax.broadcasted_iota(jnp.int32, (tq, lk), 1)
        bias = bias + jnp.where(col <= row, 0.0, -1e9).astype(jnp.float32)
    _attn_heads(q_ref, k_ref, v_ref, o_ref, bias, num_heads, scale)


def _mha_cross_kernel(ids_ref, q_ref, k_ref, v_ref, o_ref, *,
                      num_heads, scale, tq):
    lk = k_ref.shape[1]
    bias = _pad_bias(ids_ref[0], tq, lk)
    _attn_heads(q_ref, k_ref, v_ref, o_ref, bias, num_heads, scale)


def _attn_footprint(tq, lk, d):
    return (2 * (tq * d + 2 * lk * d) * 2      # q + k + v blocks (bf16, dbl-buffered)
            + 2 * lk * 4                       # key ids
            + 2 * tq * d * 2                   # out block
            + 6 * tq * lk * 4)                 # score / prob temporaries


def mha_self(qkv, key_ids, num_heads, causal):
    """qkv:(B,L,3D) bf16, key_ids:(B,L) int32 -> (B,L,D) bf16."""
    B, L, D3 = qkv.shape
    D = D3 // 3
    tq = _pick(L, (512, 256, 128))
    scale = 1.0 / math.sqrt(D // num_heads)
    kern = functools.partial(_mha_self_kernel, num_heads=num_heads,
                             scale=scale, causal=causal, tq=tq)
    return pl.pallas_call(
        kern,
        out_shape=jax.ShapeDtypeStruct((B, L, D), jnp.bfloat16),
        grid=(B, L // tq),
        in_specs=[pl.BlockSpec((1, 1, L), lambda b, qi: (b, 0, 0)),
                  pl.BlockSpec((1, tq, D), lambda b, qi: (b, qi, 0)),   # Q tile
                  pl.BlockSpec((1, L, D), lambda b, qi: (b, 0, 1)),     # K (resident)
                  pl.BlockSpec((1, L, D), lambda b, qi: (b, 0, 2))],    # V (resident)
        out_specs=pl.BlockSpec((1, tq, D), lambda b, qi: (b, qi, 0)),
        compiler_params=_mosaic_params(("parallel", "parallel"),
                                       _attn_footprint(tq, L, D)),
    )(key_ids.reshape(B, 1, L), qkv, qkv, qkv)


def mha_cross(q, kv, key_ids, num_heads):
    """q:(B,Lq,D) bf16, kv:(B,Lk,2D) bf16, key_ids:(B,Lk) int32 -> (B,Lq,D) bf16."""
    B, Lq, D = q.shape
    Lk = kv.shape[1]
    tq = _pick(Lq, (512, 256, 128))
    scale = 1.0 / math.sqrt(D // num_heads)
    kern = functools.partial(_mha_cross_kernel, num_heads=num_heads,
                             scale=scale, tq=tq)
    return pl.pallas_call(
        kern,
        out_shape=jax.ShapeDtypeStruct((B, Lq, D), jnp.bfloat16),
        grid=(B, Lq // tq),
        in_specs=[pl.BlockSpec((1, 1, Lk), lambda b, qi: (b, 0, 0)),
                  pl.BlockSpec((1, tq, D), lambda b, qi: (b, qi, 0)),   # Q tile
                  pl.BlockSpec((1, Lk, D), lambda b, qi: (b, 0, 0)),    # K (resident)
                  pl.BlockSpec((1, Lk, D), lambda b, qi: (b, 0, 1))],   # V (resident)
        out_specs=pl.BlockSpec((1, tq, D), lambda b, qi: (b, qi, 0)),
        compiler_params=_mosaic_params(("parallel", "parallel"),
                                       _attn_footprint(tq, Lk, D)),
    )(key_ids.reshape(B, 1, Lk), q, kv, kv)


# --------------------- embedding scale + positional encoding -------------------

def _scale_pe_kernel(e_ref, pe_ref, o_ref, *, scale):
    o_ref[...] = (e_ref[...] * scale + pe_ref[...]).astype(o_ref.dtype)


def embed_scale_pe(emb, pe, d_model):
    """bf16(emb*sqrt(d_model) + pe[:L]) as a flat lane-dense (B*L, D) kernel."""
    B, L, D = emb.shape
    e2 = emb.reshape(B * L, D)
    pe_l = pe[:L]
    tl = _pick(L, (1024, 512, 256, 128, 64, 32, 16, 8))
    n_pe_blocks = L // tl
    kern = functools.partial(_scale_pe_kernel, scale=math.sqrt(d_model))
    out = pl.pallas_call(
        kern,
        out_shape=jax.ShapeDtypeStruct((B * L, D), jnp.bfloat16),
        grid=((B * L) // tl,),
        in_specs=[pl.BlockSpec((tl, D), lambda i: (i, 0)),
                  pl.BlockSpec((tl, D), lambda i: (i % n_pe_blocks, 0))],
        out_specs=pl.BlockSpec((tl, D), lambda i: (i, 0)),
        compiler_params=_mosaic_params(("parallel",), 8 * tl * D * 4),
    )(e2, pe_l)
    return out.reshape(B, L, D)


# ------------------------------ model glue -------------------------------------

def encoder_layer(x, src_ids, p, num_heads):
    B, L, D = x.shape
    x2 = x.reshape(B * L, D)                       # bf16 residual

    qkv = matmul_bias(x2, p['w_qkv'], p['b_qkv']).reshape(B, L, 3 * D)
    attn = mha_self(qkv, src_ids, num_heads, causal=False).reshape(B * L, D)
    x1 = matmul_res_ln(attn, p['wo'], p['bo'], x2, p['ln1_g'], p['ln1_b'])

    h = matmul_bias(x1, p['w1'], p['b1'], relu=True)
    x_out = matmul_res_ln(h, p['w2'], p['b2'], x1, p['ln2_g'], p['ln2_b'])
    return x_out.reshape(B, L, D)


def decoder_layer(y, memory, tgt_ids, src_ids, p, num_heads):
    B, Lt, D = y.shape
    Ls = memory.shape[1]
    y2 = y.reshape(B * Lt, D)                      # bf16 residual

    # masked self-attention
    qkv = matmul_bias(y2, p['sa_w_qkv'], p['sa_b_qkv']).reshape(B, Lt, 3 * D)
    sa = mha_self(qkv, tgt_ids, num_heads, causal=True).reshape(B * Lt, D)
    y1 = matmul_res_ln(sa, p['sa_wo'], p['sa_bo'], y2, p['ln1_g'], p['ln1_b'])

    # cross-attention over encoder memory
    q = matmul_bias(y1, p['ca_wq'], p['ca_bq']).reshape(B, Lt, D)
    kv = matmul_bias(memory.reshape(B * Ls, D),
                     p['ca_w_kv'], p['ca_b_kv']).reshape(B, Ls, 2 * D)
    ca = mha_cross(q, kv, src_ids, num_heads).reshape(B * Lt, D)
    y2n = matmul_res_ln(ca, p['ca_wo'], p['ca_bo'], y1, p['ln2_g'], p['ln2_b'])

    # feed-forward
    h = matmul_bias(y2n, p['w1'], p['b1'], relu=True)
    y3 = matmul_res_ln(h, p['w2'], p['b2'], y2n, p['ln3_g'], p['ln3_b'])
    return y3.reshape(B, Lt, D)


def make_pe(max_len, d_model):
    position = jnp.arange(max_len, dtype=jnp.float32)[:, None]
    div_term = jnp.exp(jnp.arange(0, d_model, 2, dtype=jnp.float32)
                       * -(math.log(10000.0) / d_model))
    pe = jnp.zeros((max_len, d_model), jnp.float32)
    pe = pe.at[:, 0::2].set(jnp.sin(position * div_term))
    pe = pe.at[:, 1::2].set(jnp.cos(position * div_term))
    return pe


def transformer_forward(params, src, tgt, *, num_heads, d_model):
    B, Ls = src.shape
    _, Lt = tgt.shape

    # --- encode ---
    src_e = params['src_emb'][src]                 # embedding gather (XLA glue)
    x = embed_scale_pe(src_e, params['pe'], d_model)
    for p in params['enc_layers']:
        x = encoder_layer(x, src, p, num_heads)
    memory = x

    # --- decode ---
    tgt_e = params['tgt_emb'][tgt]
    y = embed_scale_pe(tgt_e, params['pe'], d_model)
    for p in params['dec_layers']:
        y = decoder_layer(y, memory, tgt, src, p, num_heads)

    # --- generator ---
    logits = matmul_bias(y.reshape(B * Lt, d_model),
                         params['gen_w'], params['gen_b'], out_dtype=jnp.float32)
    return logits.reshape(B, Lt, -1)


# ---------------------------- parameter init ------------------------------------

def _xavier(key, shape):
    fan_in, fan_out = shape[0], shape[1]
    limit = math.sqrt(6.0 / (fan_in + fan_out))
    return jax.random.uniform(key, shape, jnp.float32, -limit, limit)


def init_params(key, *, src_vocab, tgt_vocab, d_model, d_ff,
                num_enc_layers, num_dec_layers, max_seq_len):
    n_keys = 8 + 8 * num_enc_layers + 12 * num_dec_layers
    keys = iter(jax.random.split(key, n_keys))
    bf16 = jnp.bfloat16

    def fused_proj(n_chunks):
        w = jnp.concatenate([_xavier(next(keys), (d_model, d_model))
                             for _ in range(n_chunks)], axis=1)
        return w.astype(bf16), jnp.zeros((n_chunks * d_model,), jnp.float32)

    def enc_layer():
        w_qkv, b_qkv = fused_proj(3)
        return {
            'w_qkv': w_qkv, 'b_qkv': b_qkv,
            'wo': _xavier(next(keys), (d_model, d_model)).astype(bf16),
            'bo': jnp.zeros((d_model,), jnp.float32),
            'w1': _xavier(next(keys), (d_model, d_ff)).astype(bf16),
            'b1': jnp.zeros((d_ff,), jnp.float32),
            'w2': _xavier(next(keys), (d_ff, d_model)).astype(bf16),
            'b2': jnp.zeros((d_model,), jnp.float32),
            'ln1_g': jnp.ones((d_model,), jnp.float32), 'ln1_b': jnp.zeros((d_model,), jnp.float32),
            'ln2_g': jnp.ones((d_model,), jnp.float32), 'ln2_b': jnp.zeros((d_model,), jnp.float32),
        }

    def dec_layer():
        sa_w_qkv, sa_b_qkv = fused_proj(3)
        ca_w_kv, ca_b_kv = fused_proj(2)
        return {
            'sa_w_qkv': sa_w_qkv, 'sa_b_qkv': sa_b_qkv,
            'sa_wo': _xavier(next(keys), (d_model, d_model)).astype(bf16),
            'sa_bo': jnp.zeros((d_model,), jnp.float32),
            'ca_wq': _xavier(next(keys), (d_model, d_model)).astype(bf16),
            'ca_bq': jnp.zeros((d_model,), jnp.float32),
            'ca_w_kv': ca_w_kv, 'ca_b_kv': ca_b_kv,
            'ca_wo': _xavier(next(keys), (d_model, d_model)).astype(bf16),
            'ca_bo': jnp.zeros((d_model,), jnp.float32),
            'w1': _xavier(next(keys), (d_model, d_ff)).astype(bf16),
            'b1': jnp.zeros((d_ff,), jnp.float32),
            'w2': _xavier(next(keys), (d_ff, d_model)).astype(bf16),
            'b2': jnp.zeros((d_model,), jnp.float32),
            'ln1_g': jnp.ones((d_model,), jnp.float32), 'ln1_b': jnp.zeros((d_model,), jnp.float32),
            'ln2_g': jnp.ones((d_model,), jnp.float32), 'ln2_b': jnp.zeros((d_model,), jnp.float32),
            'ln3_g': jnp.ones((d_model,), jnp.float32), 'ln3_b': jnp.zeros((d_model,), jnp.float32),
        }

    return {
        'src_emb': _xavier(next(keys), (src_vocab, d_model)),
        'tgt_emb': _xavier(next(keys), (tgt_vocab, d_model)),
        'pe': make_pe(max_seq_len, d_model),
        'enc_layers': [enc_layer() for _ in range(num_enc_layers)],
        'dec_layers': [dec_layer() for _ in range(num_dec_layers)],
        'gen_w': _xavier(next(keys), (d_model, tgt_vocab)).astype(bf16),
        'gen_b': jnp.zeros((tgt_vocab,), jnp.float32),
    }


# --------------------------------- main ------------------------------------------

if __name__ == "__main__":
    # Small config consistent with the module's constructor arguments
    # (d_model kept at a lane-friendly 128 so every lane block is (8,128)-aligned).
    SRC_VOCAB, TGT_VOCAB = 256, 256
    D_MODEL, NUM_HEADS = 128, 4
    NUM_ENC, NUM_DEC = 2, 2
    D_FF, MAX_SEQ = 256, 64
    B, LS, LT = 2, 8, 8

    root = jax.random.PRNGKey(0)
    k_param, k_src, k_tgt = jax.random.split(root, 3)

    params = init_params(k_param, src_vocab=SRC_VOCAB, tgt_vocab=TGT_VOCAB,
                         d_model=D_MODEL, d_ff=D_FF,
                         num_enc_layers=NUM_ENC, num_dec_layers=NUM_DEC,
                         max_seq_len=MAX_SEQ)

    src = jax.random.randint(k_src, (B, LS), 1, SRC_VOCAB, dtype=jnp.int32)
    tgt = jax.random.randint(k_tgt, (B, LT), 1, TGT_VOCAB, dtype=jnp.int32)

    logits = transformer_forward(params, src, tgt,
                                 num_heads=NUM_HEADS, d_model=D_MODEL)
    logits = jax.block_until_ready(logits)

    assert logits.shape == (B, LT, TGT_VOCAB), logits.shape
    assert bool(jnp.all(jnp.isfinite(logits)))
    print("KERNEL_OK")
</pallas_src>

<mosaic_0001>
module attributes {stable_mosaic.version = 11 : i64} {
  func.func @_scale_pe_kernel(%arg0: i32, %arg1: memref<8x128xf32, #tpu.memory_space<vmem>>, %arg2: memref<8x128xf32, #tpu.memory_space<vmem>>, %arg3: memref<8x128xbf16, #tpu.memory_space<vmem>>) attributes {dimension_semantics = [#tpu.dimension_semantics<parallel>], iteration_bounds = array<i64: 2>, scalar_prefetch = 0 : i64, scratch_operands = 0 : i64, tpu.core_type = #tpu.core_type<tc>, window_params = [{transform_indices = @transform_0, window_bounds = array<i64: 8, 128>}, {transform_indices = @transform_1, window_bounds = array<i64: 8, 128>}, {transform_indices = @transform_2, window_bounds = array<i64: 8, 128>}]} {
    %c0 = arith.constant 0 : index
    %c0_0 = arith.constant 0 : index
    %0 = vector.load %arg1[%c0, %c0_0] : memref<8x128xf32, #tpu.memory_space<vmem>>, vector<8x128xf32>
    %cst = arith.constant 11.3137083 : f32
    %1 = vector.broadcast %cst : f32 to vector<8x128xf32>
    %2 = arith.mulf %0, %1 : vector<8x128xf32>
    %c0_1 = arith.constant 0 : index
    %c0_2 = arith.constant 0 : index
    %3 = vector.load %arg2[%c0_1, %c0_2] : memref<8x128xf32, #tpu.memory_space<vmem>>, vector<8x128xf32>
    %4 = arith.addf %2, %3 : vector<8x128xf32>
    %5 = arith.truncf %4 : vector<8x128xf32> to vector<8x128xbf16>
    %c0_3 = arith.constant 0 : index
    %c0_4 = arith.constant 0 : index
    %6 = vector.load %arg3[%c0_3, %c0_4] : memref<8x128xbf16, #tpu.memory_space<vmem>>, vector<8x128xbf16>
    tpu.vector_store %arg3[%c0_3, %c0_4], %5 {strides = array<i32>} : memref<8x128xbf16, #tpu.memory_space<vmem>>, vector<8x128xbf16>,
    return
  }
  func.func @transform_0(%arg0: i32) -> (i32, i32) {
    %c0_i32 = arith.constant 0 : i32
    %c0_i32_0 = arith.constant 0 : i32
    return %arg0, %c0_i32 : i32, i32
  }
  func.func @transform_1(%arg0: i32) -> (i32, i32) {
    %c1_i32 = arith.constant 1 : i32
    %c0_i32 = arith.constant 0 : i32
    %0 = arith.cmpi eq, %c1_i32, %c0_i32 : i32
    %c1_i32_0 = arith.constant 1 : i32
    %1 = arith.select %0, %c1_i32_0, %c1_i32 : i32
    %2 = arith.remsi %arg0, %1 : i32
    %c0_i32_1 = arith.constant 0 : i32
    %3 = arith.cmpi ne, %2, %c0_i32_1 : i32
    %c0_i32_2 = arith.constant 0 : i32
    %4 = arith.cmpi slt, %2, %c0_i32_2 : i32
    %c0_i32_3 = arith.constant 0 : i32
    %5 = arith.cmpi slt, %1, %c0_i32_3 : i32
    %6 = arith.xori %4, %5 : i1
    %7 = arith.andi %6, %3 : i1
    %8 = arith.addi %2, %1 : i32
    %9 = arith.select %7, %8, %2 : i32
    %c0_i32_4 = arith.constant 0 : i32
    %c0_i32_5 = arith.constant 0 : i32
    return %9, %c0_i32_4 : i32, i32
  }
  func.func @transform_2(%arg0: i32) -> (i32, i32) {
    %c0_i32 = arith.constant 0 : i32
    %c0_i32_0 = arith.constant 0 : i32
    return %arg0, %c0_i32 : i32, i32
  }
}

</mosaic_0001>

<bundles_post_ra>
// kernel: tpu_custom_call.1
= control target key start
LH: loop header
LB: loop body
LE: loop exit
PB: predicated region body
PF: predicated region fallthrough
CT: control target
= control target key end

     0   :  { %7 = vsyncpa [#allocation3], 0  ;;  %s652_s0 = inlined_call_operand.hbm [shape: f32[16,128], index: 0, kind: input, shape index: {}]   ;;  %s653_s1 = inlined_call_operand.hbm [shape: f32[8,128], index: 1, kind: input, shape index: {}]   ;;  %s654_s2 = inlined_call_operand.hbm [shape: bf16[16,128], index: 2, kind: output, shape index: {}]  }
   0x1   :  { %9 = vsyncpa [#allocation3 + $0x1], 0 }
   0x2   :  { %10 = vsyncpa [#allocation6], 0 }
   0x3   :  { %11 = vsyncpa [#allocation4], 0 }
   0x4   :  { %13 = vsyncpa [#allocation4 + $0x1], 0  ;;  %s485_s9 = smov 0   ;;  %s487_s10 = smov 0  }
   0x5   :  { %s489_s11 = smov 0   ;;  %s491_s12 = smov 0  }
   0x6 LB: > { %s506_s13 = sadd.s32 4294967295, %s465_s12   ;;  %s272_s14 = sadd.s32 4294967294, %s465_s12   ;;  %s465_s12 = sphi %s491_s12, %s677_s12   ;;  %s461_s11 = sphi %s489_s11, %s676_s11   ;;  %s457_s10 = sphi %s487_s10, %s675_s10   ;;  %s453_s9 = sphi %s485_s9, %s674_s9  }
   0x7   : > { %p39_p0 = scmp.ne.s32.totalorder %s457_s10, %s453_s9  ;;  %p655_p1 = scmp.eq.s32.totalorder %s506_s13, 0 }
   0x8   : > { %p90_p3 = scmp.eq.s32.totalorder %s272_s14, 1  ;;  %p273_p5 = scmp.ge.s32.totalorder %s465_s12, 1 }
   0x9   : > { %p515_p4 = por %p655_p1, %p39_p0  ;;  %p97_p7 = scmp.lt.s32.totalorder %s465_s12, 3 }
   0xa   : > { %p520_p6 = por %p90_p3, %p39_p0  ;;  %s467_s18 = smov [#allocation5]  }
   0xb   : > { %s659_s15 = scalar_select %p515_p4, 1, 0 }
   0xc   : > { %s660_s16 = scalar_select %p520_p6, 1, 0 }
   0xd   : > { %p525_p8 = pnand %p273_p5, %p97_p7  ;;  %s110_s19 = sshll.u32 %s467_s18, 4  ;;  %s111_s19 = int_to_ptr.vmem [resolvable:$true] %s110_s19 }
   0xe   : > { %s533_s20 = sadd.s32 1, %s465_s12   ;;  %s26_s24 = sadd.s32 1, %s461_s11 }
   0xf   : > { %s661_s17 = scalar_select %p525_p8, 1, 0 }
  0x10   : > { %p294_p10 = pneg %p525_p8  ;;  %s23_s22 = ssub.s32 %s465_s12, %s533_s20 }
  0x11   : > { %p543_p12 = scmp.eq.s32.totalorder %s23_s22, 0  ;;  %p33_p13 = scmp.ne.s32.totalorder %s461_s11, %s457_s10 }
  0x12   : > { %p537_p11 = pnand %p294_p10, %p655_p1  ;;  %s354_s25 = scalar_lea.vmem %s111_s19, 128 }
  0x13   : > { %p355_p3 = scmp.ne.s32.totalorder %s111_s19, %s354_s25  ;;  %p362_p9 = scmp.lt.s32.totalorder %s111_s19, %s111_s19 }
  0x14   : > { %p345_p0 = pneg %p537_p11  ;;  %p363_p2 = scmp.lt.s32.totalorder %s354_s25, %s354_s25 }
  0x16   : > { %p357_p5 = pnand %p355_p3, %p345_p0  ;;  %p364_p10 = por %p363_p2, %p362_p9 }
  0x18   : > { %p358_p7 = pneg %p357_p5 }
  0x1a   : > { %p365_p1 = pnand %p364_p10, %p358_p7 }
  0x1c   : > { %368 = shalt.err (!%p365_p1)
}
  0x1d   : > { %297 = dma.hbm_to_vmem [thread:$0]  (!%p537_p11), %s653_s1, 128, %s111_s19, [#allocation6]  }
  0x1e   : > { %s560_s28 = scalar_select %p543_p12, %s461_s11, %s26_s24  }
  0x1f   : > { %p34_p1 = scmp.eq.s32.totalorder %s465_s12, 0  ;;  %p664_p2 = scmp.eq.s32.totalorder %s506_s13, 1 }
  0x20   : > { %p307_p0 = scmp.lt.s32.totalorder %s465_s12, 2  ;;  %s121_s30 = sand.u32 1, %s461_s11  }
  0x21   : > { %p568_p9 = por %p664_p2, %p33_p13  ;;  %p35_p3 = por %p34_p1, %p33_p13 }
  0x22   : > { %s276_s3 = sshll.u32 %s121_s30, 3  ;;  %s277_s4 = sshll.u32 %s465_s12, 7 }
  0x23   : > { %s665_s29 = scalar_select %p568_p9, 1, 0 }
  0x24   : > { %s581_s7 = scalar_lea.hbm %s652_s0, %s277_s4  ;;  %s125_s8 = scalar_lea.vmem [#allocation2], %s276_s3 }
  0x25   : > { %s132_s14 = sshll.u32 %s125_s8, 4  ;;  %p583_p11 = pnand %p307_p0, %p35_p3  ;;  %s133_s14 = int_to_ptr.vmem [resolvable:$true] %s132_s14 }
  0x26   : > { %s122_s19 = scalar_lea.sflag [#allocation3], %s121_s30  ;;  %s369_s21 = scalar_lea.hbm %s581_s7, 128 }
  0x27   : > { %p370_p12 = scmp.ne.s32.totalorder %s581_s7, %s369_s21  ;;  %p371_p13 = pneg %p583_p11 }
  0x28   : > { %s374_s24 = scalar_lea.hbm %s652_s0, 256  ;;  %p375_p10 = scmp.lt.s32.totalorder %s581_s7, %s652_s0 }
  0x29   : > { %p372_p5 = pnand %p371_p13, %p370_p12  ;;  %p376_p1 = scmp.lt.s32.totalorder %s374_s24, %s369_s21 }
  0x2b   : > { %p373_p7 = pneg %p372_p5  ;;  %p377_p2 = por %p376_p1, %p375_p10 }
  0x2d   : > { %p378_p0 = pnand %p377_p2, %p373_p7 }
  0x2f   : > { %381 = shalt.err (!%p378_p0)
}
  0x30   : > { %s382_s27 = scalar_lea.vmem %s133_s14, 128  ;;  %s468_s30 = smov [#allocation2]  }
  0x31   : > { %p383_p3 = scmp.ne.s32.totalorder %s133_s14, %s382_s27  ;;  %s387_s3 = sshll.u32 %s468_s30, 4  ;;  %s388_s3 = int_to_ptr.vmem [resolvable:$false] %s387_s3 }
  0x32   : > { %s389_s4 = scalar_lea.vmem %s388_s3, 256  ;;  %p390_p12 = scmp.lt.s32.totalorder %s133_s14, %s388_s3 }
  0x33   : > { %p385_p6 = pnand %p383_p3, %p371_p13  ;;  %p391_p5 = scmp.lt.s32.totalorder %s389_s4, %s382_s27 }
  0x35   : > { %p386_p9 = pneg %p385_p6  ;;  %p392_p4 = por %p391_p5, %p390_p12 }
  0x37   : > { %p393_p8 = pnand %p392_p4, %p386_p9 }
  0x39   : > { %396 = shalt.err (!%p393_p8)
}
  0x3a   : > { %301 = dma.hbm_to_vmem [thread:$0]  (!%p583_p11), %s581_s7, 128, %s133_s14, %s122_s19  }
  0x3b   : > { %p667_p7 = scmp.ne.s32.totalorder %s661_s17, 0 }
  0x3c   : > { %s604_s5 = sand.u32 (!%p667_p7), 1, %s457_s10   ;;  %p668_p6 = scmp.ne.s32.totalorder (!%p667_p7), %s659_s15, 0 }
  0x3d   : > { %141 = sbr.rel (%p667_p7) target bundleno = 95 (0x5f), region = 28  ;;  %s279_s6 = sshll.u32 (!%p667_p7), %s604_s5, 3 }
  0x3e   : > { %s144_s8 = scalar_lea.sflag (!%p667_p7), [#allocation3], %s604_s5  ;;  %s147_s21 = scalar_lea.vmem (!%p667_p7), [#allocation2], %s279_s6 }
  0x42   : > { %440 = dma.done.wait (%p668_p6), %s144_s8, 128  }
  0x43   : > { %442 = vsyncadd (%p668_p6), %s144_s8, 4294967168  ;;  %p669_p4 = scmp.eq.s32.totalorder %s506_s13, 0 }
  0x45   : > { %444 = dma.done.wait (%p669_p4), [#allocation6], 128   ;;  %p670_p8 = pmov %p669_p4 }
  0x46   : > { %s281_s17 = sshll.u32 %s604_s5, 2  ;;  %v172_v0 = vld [vmem:[%s147_s21] sm:$0xff]  ;;  %v174_v1 = vld [vmem:[#allocation5] sm:$0xff]  ;;  %s283_s18 = sshll.u32 %s506_s13, 6 }
  0x47   : > { %446 = vsyncadd (%p670_p8), [#allocation6], 4294967168  ;;  %v173_v2 = vmul.f32 11.313708, %v172_v0  ;;  %s171_s7 = scalar_lea.vmem [#allocation7], %s281_s17  ;;  %s190_s22 = scalar_lea.hbm %s654_s2, %s283_s18 }
  0x48   : > { %s192_s14 = sshll.u32 %s171_s7, 4  ;;  %s179_s23 = scalar_lea.sflag [#allocation4], %s604_s5  ;;  %s193_s14 = int_to_ptr.vmem [resolvable:$true] %s192_s14 }
  0x49   : > { %v175_v3 = vadd.f32 %v174_v1, %v173_v2  ;;  %s397_s24 = scalar_lea.vmem %s193_s14, 64  ;;  %p671_p11 = scmp.ne.s32.totalorder %s665_s29, 0 }
  0x4a   : > { %p398_p9 = scmp.ne.s32.totalorder %s193_s14, %s397_s24  ;;  %s469_s25 = smov [#allocation7]  }
  0x4b   : > { %v176_v4 = vpack.c.bf16 %v175_v3, %v175_v3  ;;  %s401_s26 = sshll.u32 %s469_s25, 4  ;;  %s402_s26 = int_to_ptr.vmem [resolvable:$false] %s401_s26 }
  0x4c   : > { %p399_p13 = pnand %p398_p9, %p671_p11  ;;  %s403_s27 = scalar_lea.vmem %s402_s26, 128 }
  0x4d   : > { %177 = vst [vmem:[%s171_s7] sm:$0xf] %v176_v4  ;;  %p404_p1 = scmp.lt.s32.totalorder %s193_s14, %s402_s26  ;;  %p405_p2 = scmp.lt.s32.totalorder %s403_s27, %s397_s24 }
  0x4e   : > { %p400_p10 = pneg %p399_p13 }
  0x4f   : > { %p406_p0 = por %p405_p2, %p404_p1 }
  0x51   : > { %p407_p3 = pnand %p406_p0, %p400_p10 }
  0x53   : > { %410 = shalt.err (!%p407_p3)
}
  0x54   : > { %s411_s13 = scalar_lea.hbm %s190_s22, 64  ;;  %s415_s4 = scalar_lea.hbm %s654_s2, 128 }
  0x55   : > { %p412_p12 = scmp.ne.s32.totalorder %s190_s22, %s411_s13  ;;  %p416_p6 = scmp.lt.s32.totalorder %s190_s22, %s654_s2 }
  0x56   : > { %p417_p4 = scmp.lt.s32.totalorder %s415_s4, %s411_s13 }
  0x57   : > { %p413_p5 = pnand %p412_p12, %p671_p11 }
  0x58   : > { %p418_p8 = por %p417_p4, %p416_p6 }
  0x59   : > { %p414_p7 = pneg %p413_p5 }
  0x5b   : > { %p419_p9 = pnand %p418_p8, %p414_p7 }
  0x5d   : > { %422 = shalt.err (!%p419_p9)
}
  0x5e   : > { %292 = dma.vmem_to_hbm [thread:$0]  (%p671_p11), %s193_s14, 64, %s190_s22, %s179_s23  }
  0x5f PF: > { %s204_s8 = sand.u32 1, %s453_s9   ;;  %p672_p13 = scmp.ne.s32.totalorder %s660_s16, 0 }
  0x60   : > { %p673_p10 = scmp.ge.s32.totalorder %s465_s12, 2  ;;  %s205_s21 = scalar_lea.sflag [#allocation4], %s204_s8 }
  0x62   : > { %p303_p1 = pnand %p673_p10, %p672_p13 }
  0x64   : > { %p304_p2 = pneg %p303_p1 }
  0x66   : > { %448 = dma.done.wait (%p304_p2), %s205_s21, 64  }
  0x67   : > { %450 = vsyncadd (%p304_p2), %s205_s21, 4294967232  ;;  %p16_p0 = scmp.ge.s32.totalorder %s533_s20, 4   ;;  %s674_s9 = smov %s457_s10 }
  0x68   : > { %s675_s10 = smov %s461_s11  ;;  %s676_s11 = smov %s560_s28 }
  0x69   : > { %s677_s12 = smov %s533_s20  ;;  %18 = sbr.rel (!%p16_p0) target bundleno = 6 (0x6), region = 77 }
  0x6e   :  { %210 = vsyncpa [#allocation3], 1 }
  0x6f   :  { %212 = vsyncpa [#allocation3 + $0x1], 1 }
  0x70   :  { %213 = vsyncpa [#allocation6], 1 }
  0x71   :  { %214 = vsyncpa [#allocation4], 1 }
  0x72   :  { %216 = vsyncpa [#allocation4 + $0x1], 1 }

</bundles_post_ra>
